<compile_context>
chip_gen: v5e
topology: v5e:2x2
jax: 0.10.0
libtpu: 0.0.40
codegen_flags: <defaults>
</compile_context>

<pallas_src>
import functools

import jax
import jax.numpy as jnp
from jax.experimental import pallas as pl
from jax.experimental.pallas import tpu as pltpu

BN_EPS = 1e-5
_VMEM_LIMIT = 32 * 1024 * 1024  # headroom; actual footprint ~8-10 MiB at TB=2048


def _round_up(x, m):
    return ((x + m - 1) // m) * m


def _bn_relu_mlp(x0, action, scale, shift, w1at, w1bt, b1, w2row, b2_scalar):
    """Shared tail: folded-BN FMA + relu, split-concat Linear, lane-dense head."""
    # BN (affine folded) + ReLU: single FMA per row.
    x = jnp.maximum(x0 * scale + shift, 0.0)
    # Linear(H + action -> H) on concat([x, action]) as a split matmul.
    h = jnp.maximum(
        jnp.dot(x, w1at, preferred_element_type=jnp.float32)
        + jnp.dot(action, w1bt, preferred_element_type=jnp.float32)
        + b1, 0.0)
    # Linear(H -> 1) as (1,H) x (TB,H)^T -> (1,TB): output row is lane-dense
    # (unmasked stores, dense sigmoid) instead of a masked (TB,1) column.
    q = jax.lax.dot_general(w2row, h, (((1,), (1,)), ((), ())),
                            preferred_element_type=jnp.float32)
    return jax.nn.sigmoid(q + b2_scalar)


# ----------------------------------------------------------------------------
# Fused single-kernel path (whole batch VMEM-resident)
# ----------------------------------------------------------------------------
def _fused_kernel(state_ref, action_ref, gamma_ref, beta_ref, w0t_ref,
                  w1at_ref, w1bt_ref, b1_ref, w2row_ref, b2_ref, out_ref,
                  *, inv_n):
    x0 = jnp.dot(state_ref[...], w0t_ref[...],
                 preferred_element_type=jnp.float32)
    # Zero pad rows contribute exactly 0 (no b0 added), so dividing by the
    # true batch size keeps the statistics exact.
    mean = jnp.sum(x0, axis=0, keepdims=True) * inv_n
    ex2 = jnp.sum(x0 * x0, axis=0, keepdims=True) * inv_n
    var = jnp.maximum(ex2 - mean * mean, 0.0)
    scale = gamma_ref[...] * jax.lax.rsqrt(var + BN_EPS)   # EUP rsqrt
    shift = beta_ref[...] - mean * scale
    out_ref[...] = _bn_relu_mlp(x0, action_ref[...], scale, shift,
                                w1at_ref[...], w1bt_ref[...], b1_ref[...],
                                w2row_ref[...], b2_ref[0, 0])


# ----------------------------------------------------------------------------
# Large-batch pass 1: per-tile partial BN sums (no x0 writeback to HBM)
# ----------------------------------------------------------------------------
def _stats_kernel(state_ref, w0t_ref, s1_ref, s2_ref):
    x0 = jnp.dot(state_ref[...], w0t_ref[...],
                 preferred_element_type=jnp.float32)
    s1_ref[...] = jnp.sum(x0, axis=0, keepdims=True)
    s2_ref[...] = jnp.sum(x0 * x0, axis=0, keepdims=True)


# ----------------------------------------------------------------------------
# Large-batch pass 2: fold stats in-kernel, recompute x0, BN + layer1 + head
# ----------------------------------------------------------------------------
def _apply_kernel(state_ref, action_ref, s1p_ref, s2p_ref, gamma_ref, beta_ref,
                  w0t_ref, w1at_ref, w1bt_ref, b1_ref, w2row_ref, b2_ref,
                  out_ref, *, inv_n):
    mean = jnp.sum(s1p_ref[...], axis=0, keepdims=True) * inv_n
    ex2 = jnp.sum(s2p_ref[...], axis=0, keepdims=True) * inv_n
    var = jnp.maximum(ex2 - mean * mean, 0.0)
    scale = gamma_ref[...] * jax.lax.rsqrt(var + BN_EPS)
    shift = beta_ref[...] - mean * scale
    # Recompute x0 from the streamed state tile (cheaper than an x0 HBM trip).
    x0 = jnp.dot(state_ref[...], w0t_ref[...],
                 preferred_element_type=jnp.float32)
    out_ref[...] = _bn_relu_mlp(x0, action_ref[...], scale, shift,
                                w1at_ref[...], w1bt_ref[...], b1_ref[...],
                                w2row_ref[...], b2_ref[0, 0])


def critic_forward(state, action, params, *, tb_max=2048):
    """Critic forward pass.

    state:  (B, state_size) float32
    action: (B, action_size) float32
    returns (B, 1) float32 Q-values in (0, 1)
    """
    B, S = state.shape
    A = action.shape[1]
    H = params["w0t"].shape[1]
    inv_n = 1.0 / B  # trace-time constant

    if B <= tb_max:
        # ---- single fused kernel (whole batch VMEM-resident) -------------
        Bp = max(8, _round_up(B, 8))
        pad = Bp - B
        if pad:
            state = jnp.pad(state, ((0, pad), (0, 0)))
            action = jnp.pad(action, ((0, pad), (0, 0)))
        out = pl.pallas_call(
            functools.partial(_fused_kernel, inv_n=inv_n),
            out_shape=jax.ShapeDtypeStruct((1, Bp), jnp.float32),
            grid=(1,),
            in_specs=[
                pl.BlockSpec((Bp, S), lambda i: (0, 0)),
                pl.BlockSpec((Bp, A), lambda i: (0, 0)),
                pl.BlockSpec((1, H), lambda i: (0, 0)),
                pl.BlockSpec((1, H), lambda i: (0, 0)),
                pl.BlockSpec((S, H), lambda i: (0, 0)),
                pl.BlockSpec((H, H), lambda i: (0, 0)),
                pl.BlockSpec((A, H), lambda i: (0, 0)),
                pl.BlockSpec((1, H), lambda i: (0, 0)),
                pl.BlockSpec((1, H), lambda i: (0, 0)),
                pl.BlockSpec((1, 1), lambda i: (0, 0),
                             memory_space=pltpu.MemorySpace.SMEM),
            ],
            out_specs=pl.BlockSpec((1, Bp), lambda i: (0, 0)),
            compiler_params=pltpu.CompilerParams(
                dimension_semantics=("arbitrary",),
                vmem_limit_bytes=_VMEM_LIMIT),
        )(state, action, params["gamma"], params["beta"], params["w0t"],
          params["w1at"], params["w1bt"], params["b1"], params["w2row"],
          params["b2"])
        return out.reshape(Bp, 1)[:B]

    # ---- large batch: two batch-tiled passes ------------------------------
    TB = _round_up(tb_max, 128)          # lane-dense output blocks need 128x
    Bp = _round_up(B, TB)
    pad = Bp - B
    if pad:
        # Zero pad rows contribute exactly 0 to the BN sums (no b0 added).
        state = jnp.pad(state, ((0, pad), (0, 0)))
        action = jnp.pad(action, ((0, pad), (0, 0)))
    nb = Bp // TB

    # Pass 1: per-tile partial BN statistics (parallel -> splits across TCs).
    s1p, s2p = pl.pallas_call(
        _stats_kernel,
        out_shape=(jax.ShapeDtypeStruct((nb, H), jnp.float32),
                   jax.ShapeDtypeStruct((nb, H), jnp.float32)),
        grid=(nb,),
        in_specs=[pl.BlockSpec((TB, S), lambda i: (i, 0)),
                  pl.BlockSpec((S, H), lambda i: (0, 0))],
        out_specs=(pl.BlockSpec((1, H), lambda i: (i, 0)),
                   pl.BlockSpec((1, H), lambda i: (i, 0))),
        compiler_params=pltpu.CompilerParams(
            dimension_semantics=("parallel",),
            vmem_limit_bytes=_VMEM_LIMIT),
    )(state, params["w0t"])

    # Pass 2: fold stats + recompute x0 + layer1 + lane-dense head.
    out = pl.pallas_call(
        functools.partial(_apply_kernel, inv_n=inv_n),
        out_shape=jax.ShapeDtypeStruct((1, Bp), jnp.float32),
        grid=(nb,),
        in_specs=[
            pl.BlockSpec((TB, S), lambda i: (i, 0)),
            pl.BlockSpec((TB, A), lambda i: (i, 0)),
            pl.BlockSpec((nb, H), lambda i: (0, 0)),
            pl.BlockSpec((nb, H), lambda i: (0, 0)),
            pl.BlockSpec((1, H), lambda i: (0, 0)),
            pl.BlockSpec((1, H), lambda i: (0, 0)),
            pl.BlockSpec((S, H), lambda i: (0, 0)),
            pl.BlockSpec((H, H), lambda i: (0, 0)),
            pl.BlockSpec((A, H), lambda i: (0, 0)),
            pl.BlockSpec((1, H), lambda i: (0, 0)),
            pl.BlockSpec((1, H), lambda i: (0, 0)),
            pl.BlockSpec((1, 1), lambda i: (0, 0),
                         memory_space=pltpu.MemorySpace.SMEM),
        ],
        out_specs=pl.BlockSpec((1, TB), lambda i: (0, i)),
        compiler_params=pltpu.CompilerParams(
            dimension_semantics=("parallel",),
            vmem_limit_bytes=_VMEM_LIMIT),
    )(state, action, s1p, s2p, params["gamma"], params["beta"],
      params["w0t"], params["w1at"], params["w1bt"], params["b1"],
      params["w2row"], params["b2"])

    return out.reshape(Bp, 1)[:B]


def init_critic_params(key, state_size, action_size, hidden=128):
    """Deterministic synthetic init matching the PyTorch module's shapes.

    Weights ~ U(-0.003, 0.003) (as in _reset_parameters); biases ~ default
    PyTorch Linear init U(-1/sqrt(fan_in), 1/sqrt(fan_in)); BN gamma=1, beta=0.
    """
    ks = jax.random.split(key, 6)
    H = hidden

    def u(k, shape, lo, hi):
        return jax.random.uniform(k, shape, jnp.float32, lo, hi)

    w0 = u(ks[0], (H, state_size), -0.003, 0.003)
    b0 = u(ks[1], (1, H), -1.0 / state_size**0.5, 1.0 / state_size**0.5)
    fan1 = H + action_size
    w1 = u(ks[2], (H, fan1), -0.003, 0.003)
    b1 = u(ks[3], (1, H), -1.0 / fan1**0.5, 1.0 / fan1**0.5)
    w2 = u(ks[4], (1, H), -0.003, 0.003)
    b2 = u(ks[5], (1, 1), -1.0 / H**0.5, 1.0 / H**0.5)

    return {
        "w0t": w0.T,                       # (state, H)
        "b0": b0,                          # (1, H) — cancels under BN; kernel skips it
        "gamma": jnp.ones((1, H), jnp.float32),
        "beta": jnp.zeros((1, H), jnp.float32),
        "w1at": w1[:, :H].T,               # (H, H)      — bn/relu branch of the concat
        "w1bt": w1[:, H:].T,               # (action, H) — action branch of the concat
        "b1": b1,                          # (1, H)
        "w2row": w2,                       # (1, H)
        "b2": b2,                          # (1, 1)
    }


def critic_reference(state, action, params):
    """Pure-JAX reference implementing the exact PyTorch forward (incl. b0)."""
    x = state @ params["w0t"] + params["b0"]
    mean = jnp.mean(x, axis=0, keepdims=True)
    var = jnp.mean((x - mean) ** 2, axis=0, keepdims=True)
    x = (x - mean) / jnp.sqrt(var + BN_EPS) * params["gamma"] + params["beta"]
    x = jnp.maximum(x, 0.0)
    h = jnp.maximum(x @ params["w1at"] + action @ params["w1bt"] + params["b1"], 0.0)
    return jax.nn.sigmoid(h @ params["w2row"].T + params["b2"])


if __name__ == "__main__":
    STATE, ACTION, HIDDEN = 16, 4, 128

    key = jax.random.PRNGKey(0)
    k_state, k_action, k_params = jax.random.split(key, 3)
    params = init_critic_params(k_params, STATE, ACTION, HIDDEN)

    # Fused single-kernel path (small batch, exercises sublane padding 10->16).
    B = 10
    state = jax.random.normal(k_state, (B, STATE), jnp.float32)
    action = jax.random.uniform(k_action, (B, ACTION), jnp.float32, -1.0, 1.0)
    q = critic_forward(state, action, params)
    jax.block_until_ready(q)
    q_ref = critic_reference(state, action, params)
    assert q.shape == (B, 1)
    assert jnp.allclose(q, q_ref, atol=1e-5, rtol=1e-5), (q, q_ref)

    # Two-pass tiled path (B > tb_max): partial BN sums across tiles, x0
    # recomputed in pass 2, pad rows sliced off.
    B2 = 300
    state2 = jax.random.normal(k_state, (B2, STATE), jnp.float32)
    action2 = jax.random.uniform(k_action, (B2, ACTION), jnp.float32, -1.0, 1.0)
    q2 = critic_forward(state2, action2, params, tb_max=128)
    jax.block_until_ready(q2)
    q2_ref = critic_reference(state2, action2, params)
    assert q2.shape == (B2, 1)
    assert jnp.allclose(q2, q2_ref, atol=1e-5, rtol=1e-5), (q2, q2_ref)

    print("KERNEL_OK")
</pallas_src>

<mosaic_0001>
module attributes {stable_mosaic.version = 11 : i64} {
  func.func @_fused_kernel(%arg0: i32, %arg1: memref<16x16xf32, #tpu.memory_space<vmem>>, %arg2: memref<16x4xf32, #tpu.memory_space<vmem>>, %arg3: memref<1x128xf32, #tpu.memory_space<vmem>>, %arg4: memref<1x128xf32, #tpu.memory_space<vmem>>, %arg5: memref<16x128xf32, #tpu.memory_space<vmem>>, %arg6: memref<128x128xf32, #tpu.memory_space<vmem>>, %arg7: memref<4x128xf32, #tpu.memory_space<vmem>>, %arg8: memref<1x128xf32, #tpu.memory_space<vmem>>, %arg9: memref<1x128xf32, #tpu.memory_space<vmem>>, %arg10: memref<1x1xf32, #tpu.memory_space<smem>>, %arg11: memref<1x16xf32, #tpu.memory_space<vmem>>) attributes {dimension_semantics = [#tpu.dimension_semantics<arbitrary>], iteration_bounds = array<i64: 1>, scalar_prefetch = 0 : i64, scratch_operands = 0 : i64, tpu.core_type = #tpu.core_type<tc>, window_params = [{pipeline_mode = #tpu.pipeline_mode<synchronous>, transform_indices = @transform_0, window_bounds = array<i64: 16, 16>}, {pipeline_mode = #tpu.pipeline_mode<synchronous>, transform_indices = @transform_1, window_bounds = array<i64: 16, 4>}, {pipeline_mode = #tpu.pipeline_mode<synchronous>, transform_indices = @transform_2, window_bounds = array<i64: 1, 128>}, {pipeline_mode = #tpu.pipeline_mode<synchronous>, transform_indices = @transform_3, window_bounds = array<i64: 1, 128>}, {pipeline_mode = #tpu.pipeline_mode<synchronous>, transform_indices = @transform_4, window_bounds = array<i64: 16, 128>}, {pipeline_mode = #tpu.pipeline_mode<synchronous>, transform_indices = @transform_5, window_bounds = array<i64: 128, 128>}, {pipeline_mode = #tpu.pipeline_mode<synchronous>, transform_indices = @transform_6, window_bounds = array<i64: 4, 128>}, {pipeline_mode = #tpu.pipeline_mode<synchronous>, transform_indices = @transform_7, window_bounds = array<i64: 1, 128>}, {pipeline_mode = #tpu.pipeline_mode<synchronous>, transform_indices = @transform_8, window_bounds = array<i64: 1, 128>}, {transform_indices = @transform_9, window_bounds = array<i64: 1, 1>}, {pipeline_mode = #tpu.pipeline_mode<synchronous>, transform_indices = @transform_10, window_bounds = array<i64: 1, 16>}]} {
    %c0 = arith.constant 0 : index
    %c0_0 = arith.constant 0 : index
    %0 = vector.load %arg1[%c0, %c0_0] : memref<16x16xf32, #tpu.memory_space<vmem>>, vector<16x16xf32>
    %c0_1 = arith.constant 0 : index
    %c0_2 = arith.constant 0 : index
    %1 = vector.load %arg5[%c0_1, %c0_2] : memref<16x128xf32, #tpu.memory_space<vmem>>, vector<16x128xf32>
    %cst = arith.constant dense<0.000000e+00> : vector<16x128xf32>
    %2 = tpu.matmul %0, %1, %cst {dimension_numbers = #tpu.dot_dimension_numbers<[1], [0], [0], [1], [0, 0, 1, 1], [], []>} : vector<16x16xf32>, vector<16x128xf32>, vector<16x128xf32> -> vector<16x128xf32>
    %cst_3 = arith.constant dense<0.000000e+00> : vector<128xf32>
    %3 = vector.multi_reduction <add>, %2, %cst_3 [0] : vector<16x128xf32> to vector<128xf32>
    %4 = vector.shape_cast %3 : vector<128xf32> to vector<1x128xf32>
    %cst_4 = arith.constant 1.000000e-01 : f32
    %5 = vector.broadcast %cst_4 : f32 to vector<1x128xf32>
    %6 = arith.mulf %4, %5 : vector<1x128xf32>
    %7 = arith.mulf %2, %2 : vector<16x128xf32>
    %cst_5 = arith.constant dense<0.000000e+00> : vector<128xf32>
    %8 = vector.multi_reduction <add>, %7, %cst_5 [0] : vector<16x128xf32> to vector<128xf32>
    %9 = vector.shape_cast %8 : vector<128xf32> to vector<1x128xf32>
    %cst_6 = arith.constant 1.000000e-01 : f32
    %10 = vector.broadcast %cst_6 : f32 to vector<1x128xf32>
    %11 = arith.mulf %9, %10 : vector<1x128xf32>
    %12 = arith.mulf %6, %6 : vector<1x128xf32>
    %13 = arith.subf %11, %12 : vector<1x128xf32>
    %cst_7 = arith.constant 0.000000e+00 : f32
    %14 = vector.broadcast %cst_7 : f32 to vector<1x128xf32>
    %15 = arith.maximumf %13, %14 : vector<1x128xf32>
    %c0_8 = arith.constant 0 : index
    %c0_9 = arith.constant 0 : index
    %16 = vector.load %arg3[%c0_8, %c0_9] : memref<1x128xf32, #tpu.memory_space<vmem>>, vector<1x128xf32>
    %cst_10 = arith.constant 9.99999974E-6 : f32
    %17 = vector.broadcast %cst_10 : f32 to vector<1x128xf32>
    %18 = arith.addf %15, %17 : vector<1x128xf32>
    %19 = math.rsqrt %18 : vector<1x128xf32>
    %20 = arith.mulf %16, %19 : vector<1x128xf32>
    %c0_11 = arith.constant 0 : index
    %c0_12 = arith.constant 0 : index
    %21 = vector.load %arg4[%c0_11, %c0_12] : memref<1x128xf32, #tpu.memory_space<vmem>>, vector<1x128xf32>
    %22 = arith.mulf %6, %20 : vector<1x128xf32>
    %23 = arith.subf %21, %22 : vector<1x128xf32>
    %c0_13 = arith.constant 0 : index
    %c0_14 = arith.constant 0 : index
    %24 = vector.load %arg2[%c0_13, %c0_14] : memref<16x4xf32, #tpu.memory_space<vmem>>, vector<16x4xf32>
    %c0_15 = arith.constant 0 : index
    %c0_16 = arith.constant 0 : index
    %25 = vector.load %arg6[%c0_15, %c0_16] : memref<128x128xf32, #tpu.memory_space<vmem>>, vector<128x128xf32>
    %c0_17 = arith.constant 0 : index
    %c0_18 = arith.constant 0 : index
    %26 = vector.load %arg7[%c0_17, %c0_18] : memref<4x128xf32, #tpu.memory_space<vmem>>, vector<4x128xf32>
    %c0_19 = arith.constant 0 : index
    %c0_20 = arith.constant 0 : index
    %27 = vector.load %arg8[%c0_19, %c0_20] : memref<1x128xf32, #tpu.memory_space<vmem>>, vector<1x128xf32>
    %c0_21 = arith.constant 0 : index
    %c0_22 = arith.constant 0 : index
    %28 = vector.load %arg9[%c0_21, %c0_22] : memref<1x128xf32, #tpu.memory_space<vmem>>, vector<1x128xf32>
    %c0_23 = arith.constant 0 : index
    %c0_24 = arith.constant 0 : index
    %29 = memref.load %arg10[%c0_23, %c0_24] : memref<1x1xf32, #tpu.memory_space<smem>>
    %30 = vector.broadcast %20 : vector<1x128xf32> to vector<16x128xf32>
    %31 = arith.mulf %2, %30 : vector<16x128xf32>
    %32 = vector.broadcast %23 : vector<1x128xf32> to vector<16x128xf32>
    %33 = arith.addf %31, %32 : vector<16x128xf32>
    %cst_25 = arith.constant 0.000000e+00 : f32
    %34 = vector.broadcast %cst_25 : f32 to vector<16x128xf32>
    %35 = arith.maximumf %33, %34 : vector<16x128xf32>
    %cst_26 = arith.constant dense<0.000000e+00> : vector<16x128xf32>
    %36 = tpu.matmul %35, %25, %cst_26 {dimension_numbers = #tpu.dot_dimension_numbers<[1], [0], [0], [1], [0, 0, 1, 1], [], []>} : vector<16x128xf32>, vector<128x128xf32>, vector<16x128xf32> -> vector<16x128xf32>
    %cst_27 = arith.constant dense<0.000000e+00> : vector<16x128xf32>
    %37 = tpu.matmul %24, %26, %cst_27 {dimension_numbers = #tpu.dot_dimension_numbers<[1], [0], [0], [1], [0, 0, 1, 1], [], []>} : vector<16x4xf32>, vector<4x128xf32>, vector<16x128xf32> -> vector<16x128xf32>
    %38 = arith.addf %36, %37 : vector<16x128xf32>
    %39 = vector.broadcast %27 : vector<1x128xf32> to vector<16x128xf32>
    %40 = arith.addf %38, %39 : vector<16x128xf32>
    %cst_28 = arith.constant 0.000000e+00 : f32
    %41 = vector.broadcast %cst_28 : f32 to vector<16x128xf32>
    %42 = arith.maximumf %40, %41 : vector<16x128xf32>
    %cst_29 = arith.constant dense<0.000000e+00> : vector<1x16xf32>
    %43 = tpu.matmul %28, %42, %cst_29 {dimension_numbers = #tpu.dot_dimension_numbers<[1], [1], [0], [0], [0, 0, 1, 0], [], []>} : vector<1x128xf32>, vector<16x128xf32>, vector<1x16xf32> -> vector<1x16xf32>
    %44 = vector.broadcast %29 : f32 to vector<1x16xf32>
    %45 = arith.addf %43, %44 : vector<1x16xf32>
    %46 = arith.negf %45 : vector<1x16xf32>
    %47 = math.exp %46 : vector<1x16xf32>
    %cst_30 = arith.constant 1.000000e+00 : f32
    %48 = vector.broadcast %cst_30 : f32 to vector<1x16xf32>
    %49 = arith.addf %48, %47 : vector<1x16xf32>
    %50 = arith.divf %48, %49 : vector<1x16xf32>
    %c0_31 = arith.constant 0 : index
    %c0_32 = arith.constant 0 : index
    %51 = vector.load %arg11[%c0_31, %c0_32] : memref<1x16xf32, #tpu.memory_space<vmem>>, vector<1x16xf32>
    tpu.vector_store %arg11[%c0_31, %c0_32], %50 {strides = array<i32>} : memref<1x16xf32, #tpu.memory_space<vmem>>, vector<1x16xf32>,
    return
  }
  func.func @transform_0(%arg0: i32) -> (i32, i32) {
    %c0_i32 = arith.constant 0 : i32
    %c0_i32_0 = arith.constant 0 : i32
    %c0_i32_1 = arith.constant 0 : i32
    return %c0_i32, %c0_i32_0 : i32, i32
  }
  func.func @transform_1(%arg0: i32) -> (i32, i32) {
    %c0_i32 = arith.constant 0 : i32
    %c0_i32_0 = arith.constant 0 : i32
    %c0_i32_1 = arith.constant 0 : i32
    return %c0_i32, %c0_i32_0 : i32, i32
  }
  func.func @transform_2(%arg0: i32) -> (i32, i32) {
    %c0_i32 = arith.constant 0 : i32
    %c0_i32_0 = arith.constant 0 : i32
    %c0_i32_1 = arith.constant 0 : i32
    return %c0_i32, %c0_i32_0 : i32, i32
  }
  func.func @transform_3(%arg0: i32) -> (i32, i32) {
    %c0_i32 = arith.constant 0 : i32
    %c0_i32_0 = arith.constant 0 : i32
    %c0_i32_1 = arith.constant 0 : i32
    return %c0_i32, %c0_i32_0 : i32, i32
  }
  func.func @transform_4(%arg0: i32) -> (i32, i32) {
    %c0_i32 = arith.constant 0 : i32
    %c0_i32_0 = arith.constant 0 : i32
    %c0_i32_1 = arith.constant 0 : i32
    return %c0_i32, %c0_i32_0 : i32, i32
  }
  func.func @transform_5(%arg0: i32) -> (i32, i32) {
    %c0_i32 = arith.constant 0 : i32
    %c0_i32_0 = arith.constant 0 : i32
    %c0_i32_1 = arith.constant 0 : i32
    return %c0_i32, %c0_i32_0 : i32, i32
  }
  func.func @transform_6(%arg0: i32) -> (i32, i32) {
    %c0_i32 = arith.constant 0 : i32
    %c0_i32_0 = arith.constant 0 : i32
    %c0_i32_1 = arith.constant 0 : i32
    return %c0_i32, %c0_i32_0 : i32, i32
  }
  func.func @transform_7(%arg0: i32) -> (i32, i32) {
    %c0_i32 = arith.constant 0 : i32
    %c0_i32_0 = arith.constant 0 : i32
    %c0_i32_1 = arith.constant 0 : i32
    return %c0_i32, %c0_i32_0 : i32, i32
  }
  func.func @transform_8(%arg0: i32) -> (i32, i32) {
    %c0_i32 = arith.constant 0 : i32
    %c0_i32_0 = arith.constant 0 : i32
    %c0_i32_1 = arith.constant 0 : i32
    return %c0_i32, %c0_i32_0 : i32, i32
  }
  func.func @transform_9(%arg0: i32) -> (i32, i32) {
    %c0_i32 = arith.constant 0 : i32
    %c0_i32_0 = arith.constant 0 : i32
    %c0_i32_1 = arith.constant 0 : i32
    return %c0_i32, %c0_i32_0 : i32, i32
  }
  func.func @transform_10(%arg0: i32) -> (i32, i32) {
    %c0_i32 = arith.constant 0 : i32
    %c0_i32_0 = arith.constant 0 : i32
    %c0_i32_1 = arith.constant 0 : i32
    return %c0_i32, %c0_i32_0 : i32, i32
  }
}

</mosaic_0001>

<bundles_post_ra>
// kernel: tpu_custom_call.1
= control target key start
LH: loop header
LB: loop body
LE: loop exit
PB: predicated region body
PF: predicated region fallthrough
CT: control target
= control target key end

     0   :  { %16 = vsyncpa [#allocation4], 0  ;;  %s505_s0 = inlined_call_operand.vmem [shape: f32[16,16], index: 0, kind: input, shape index: {}]   ;;  %s506_s1 = inlined_call_operand.vmem [shape: f32[16,4], index: 1, kind: input, shape index: {}]   ;;  %s507_s2 = inlined_call_operand.vmem [shape: f32[1,128], index: 2, kind: input, shape index: {}]   ;;  %s508_s3 = inlined_call_operand.vmem [shape: f32[1,128], index: 3, kind: input, shape index: {}]   ;;  %s509_s4 = inlined_call_operand.hbm [shape: f32[16,128], index: 4, kind: input, shape index: {}]   ;;  %s510_s5 = inlined_call_operand.hbm [shape: f32[128,128], index: 5, kind: input, shape index: {}]   ;;  %s511_s6 = inlined_call_operand.vmem [shape: f32[4,128], index: 6, kind: input, shape index: {}]   ;;  %s512_s7 = inlined_call_operand.vmem [shape: f32[1,128], index: 7, kind: input, shape index: {}]   ;;  %s513_s8 = inlined_call_operand.vmem [shape: f32[1,128], index: 8, kind: input, shape index: {}]   ;;  %s514_s9 = inlined_call_operand.<no memory space> [shape: f32[1,1], index: 9, kind: input, shape index: {}]   ;;  %s515_s10 = inlined_call_operand.hbm [shape: f32[1,16], index: 10, kind: output, shape index: {}]  }
   0x1   :  { %17 = vsyncpa [#allocation7], 0 }
   0x2   :  { %18 = vsyncpa [#allocation5], 0  ;;  %s31_s15 = sshll.u32 %s509_s4, 4  ;;  %s394_s16 = smov [#allocation3]   ;;  %s32_s15 = int_to_ptr.hbm [resolvable:$true] %s31_s15 }
   0x3   :  { %s33_s17 = sshll.u32 %s394_s16, 4  ;;  %s44_s20 = sshll.u32 %s510_s5, 4  ;;  %s34_s17 = int_to_ptr.vmem [resolvable:$true] %s33_s17  ;;  %s45_s20 = int_to_ptr.hbm [resolvable:$true] %s44_s20 }
   0x4   :  { %s395_s21 = smov 128   ;;  %s396_s22 = smov 8  }
   0x5   :  { %39 = dma.hbm_to_vmem [thread:$0]  %s32_s15, 256, %s34_s17, [#allocation4], %s395_s21, %s395_s21, %s396_s22  }
   0x6   :  { %s397_s23 = smov [#allocation6]  }
   0x7   :  { %s46_s24 = sshll.u32 %s397_s23, 4  ;;  %s47_s24 = int_to_ptr.vmem [resolvable:$true] %s46_s24 }
   0x8   :  { %52 = dma.hbm_to_vmem [thread:$0]  %s45_s20, 2048, %s47_s24, [#allocation7], %s395_s21, %s395_s21, %s396_s22  }
   0x9   :  { %388 = dma.done.wait [#allocation4], 256  }
   0xa   :  { %389 = vsyncadd [#allocation4], 4294967040 }
   0xb   :  { %390 = dma.done.wait [#allocation7], 2048  }
   0xc   :  { %391 = vsyncadd [#allocation7], 4294965248  ;;  %v72_v0 = vld [vmem:[#allocation3 + $0x8] sm:$0xff]  ;;  %v71_v1 = vld [vmem:[#allocation3] sm:$0xff]  ;;  %vm73_vm0 = vcmask 130048   ;;  %vm181_vm1 = vcmask 1043456  }
   0xd   :  { %94 = vmatpush.msra.mxu0 %v72_v0  ;;  %v69_v2 = vld [vmem:[%s505_s0] sm:$0xff]  ;;  %v70_v3 = vld [vmem:[%s505_s0 + $0x8] sm:$0xff]  ;;  %v155_v7 = vld [vmem:[#allocation6 + $0x68] sm:$0xff]  ;;  %vm174_vm2 = vcmask 31744   ;;  %vm278_vm9 = vcmask 122880  }
   0xe   :  { %v157_v4 = vld [vmem:[#allocation6 + $0x78] sm:$0xff]  ;;  %v156_v6 = vld [vmem:[#allocation6 + $0x70] sm:$0xff]  ;;  %v154_v8 = vld [vmem:[#allocation6 + $0x60] sm:$0xff] }
   0xf   :  { %95 = vmatpush.msra.mxu0 %v71_v1  ;;  %208 = vmatpush.msra.mxu2 %v157_v4  ;;  %v153_v9 = vld [vmem:[#allocation6 + $0x58] sm:$0xff]  ;;  %v152_v14 = vld [vmem:[#allocation6 + $0x50] sm:$0xff]  ;;  %v151_v17 = vld [vmem:[#allocation6 + $0x48] sm:$0xff] }
  0x10   :  { %298 = vmatmul.msk.f32.vlgmr.msra.gmra.mxu0 %vm73_vm0, %v69_v2  ;;  %v150_v20 = vld [vmem:[#allocation6 + $0x40] sm:$0xff]  ;;  %v149_v23 = vld [vmem:[#allocation6 + $0x38] sm:$0xff]  ;;  %v148_v26 = vld [vmem:[#allocation6 + $0x30] sm:$0xff] }
  0x11   :  { %209 = vmatpush.msra.mxu2 %v156_v6  ;;  %v147_v29 = vld [vmem:[#allocation6 + $0x28] sm:$0xff]  ;;  %v146_v32 = vld [vmem:[#allocation6 + $0x20] sm:$0xff]  ;;  %v145_v35 = vld [vmem:[#allocation6 + $0x18] sm:$0xff] }
  0x12   :  { %v144_v36 = vld [vmem:[#allocation6 + $0x10] sm:$0xff]  ;;  %v143_v39 = vld [vmem:[#allocation6 + $0x8] sm:$0xff]  ;;  %v142_v41 = vld [vmem:[#allocation6] sm:$0xff] }
  0x13   :  { %210 = vmatpush.msra.mxu2 %v155_v7  ;;  %v158_v44 = vld [vmem:[%s511_s6] sm:$0xf]  ;;  %v141_v47 = vld [vmem:[%s506_s1 + $0x8] sm:$0xff] }
  0x14   :  { %v140_v45 = vld [vmem:[%s506_s1] sm:$0xff]  ;;  %300 = vmatpush.msk.msra.mxu1 %vm181_vm1, %v158_v44 }
  0x15   :  { %211 = vmatpush.msra.mxu2 %v154_v8  ;;  %301 = vmatmul.msk.f32.vlgmr.msra.gmra.mxu1 %vm174_vm2, %v140_v45  ;;  %v124_v52 = vld [vmem:[%s507_s2] sm:$0x1] }
  0x16   :  { %v137_v56 = vld [vmem:[%s508_s3] sm:$0x1] }
  0x17   :  { %212 = vmatpush.msra.mxu2 %v153_v9 }
  0x18   :  { %299 = vmatmul.msk.f32.gmra.mxu0 %vm73_vm0, %v70_v3 }
  0x19   :  { %213 = vmatpush.msra.mxu2 %v152_v14 }
  0x1b   :  { %214 = vmatpush.msra.mxu2 %v151_v17 }
  0x1d   :  { %215 = vmatpush.msra.mxu2 %v150_v20  ;;  %302 = vmatmul.msk.f32.gmra.mxu1 %vm174_vm2, %v141_v47 }
  0x1f   :  { %216 = vmatpush.msra.mxu2 %v149_v23 }
  0x21   :  { %217 = vmatpush.msra.mxu2 %v148_v26 }
  0x23   :  { %218 = vmatpush.msra.mxu2 %v147_v29 }
  0x25   :  { %219 = vmatpush.msra.mxu2 %v146_v32 }
  0x27   :  { %220 = vmatpush.msra.mxu2 %v145_v35 }
  0x29   :  { %221 = vmatpush.msra.mxu2 %v144_v36 }
  0x2b   :  { %222 = vmatpush.msra.mxu2 %v143_v39 }
  0x2d   :  { %223 = vmatpush.msra.mxu2 %v142_v41 }
  0x8d   :  { %v466_v5 = vpop.f32.mrf.mxu0 }
  0x8e   :  { %v111_v11 = vmul.f32 %v466_v5, %v466_v5 }
  0x92   :  { %v202_v3 = vpop.f32.mrf.mxu1 }
  0x95   :  { %v468_v10 = vpop.f32.mrf.mxu0 }
  0x96   :  { %v103_v12 = vadd.f32 %v468_v10, %v466_v5  ;;  %v112_v13 = vmul.f32 %v468_v10, %v468_v10 }
  0x98   :  { %v104_v15 = vrot.slane %v103_v12, 4  ;;  %v113_v16 = vadd.f32 %v112_v13, %v111_v11  ;;  %v309_v11 = vld [vmem:[%s512_s7] ss:$0 sm:$0xff]  ;;  %s398_s7 = smov [#allocation8]  }
  0x9a   :  { %v105_v18 = vadd.f32 %v104_v15, %v103_v12  ;;  %v114_v19 = vrot.slane %v113_v16, 4  ;;  %v205_v6 = vpop.f32.mrf.mxu1  ;;  %v238_v15 = vstv %s514_s9  ;;  %s287_s9 = sshll.u32 %s515_s10, 4  ;;  %s288_s9 = int_to_ptr.hbm [resolvable:$true] %s287_s9 }
  0x9c   :  { %v106_v21 = vrot.slane %v105_v18, 2  ;;  %v115_v22 = vadd.f32 %v114_v19, %v113_v16 }
  0x9e   :  { %v107_v24 = vadd.f32 %v106_v21, %v105_v18  ;;  %v116_v25 = vrot.slane %v115_v22, 2 }
  0xa0   :  { %v108_v27 = vrot.slane %v107_v24, 1  ;;  %v117_v28 = vadd.f32 %v116_v25, %v115_v22 }
  0xa2   :  { %v109_v30 = vadd.f32 %v108_v27, %v107_v24  ;;  %v118_v31 = vrot.slane %v117_v28, 1 }
  0xa4   :  { %v110_v33 = vmul.f32 0.1, %v109_v30  ;;  %v119_v34 = vadd.f32 %v118_v31, %v117_v28 }
  0xa6   :  { %v120_v37 = vmul.f32 0.1, %v119_v34  ;;  %v121_v38 = vmul.f32 %v110_v33, %v110_v33 }
  0xa8   :  { %v122_v40 = vsub.f32 %v120_v37, %v121_v38 }
  0xaa   :  { %v123_v42 = vmax.f32 %v122_v40, 0.0 }
  0xac   :  { %v125_v43 = vadd.f32 1e-05, %v123_v42 }
  0xae   :  { %310 = vrsqrt.f32 %v125_v43  ;;  %vm132_vm4 = vweird.f32 %v125_v43 }
  0xb4   :  { %v311_v46 = vpop.eup %310 }
  0xb5   :  { %v127_v48 = vmul.f32 %v311_v46, %v125_v43  ;;  %vm133_vm3 = vweird.f32 %v311_v46 }
  0xb6   :  { %vm134_vm5 = vmor %vm132_vm4, %vm133_vm3 }
  0xb7   :  { %v128_v49 = vmul.f32 %v311_v46, %v127_v48 }
  0xb9   :  { %v129_v50 = vmul.f32 0.5, %v128_v49 }
  0xbb   :  { %v130_v51 = vsub.f32 1.5, %v129_v50 }
  0xbd   :  { %v131_v53 = vmul.f32 %v311_v46, %v130_v51 }
  0xbf   :  { %v135_v54 = vsel %vm134_vm5, %v311_v46, %v131_v53 }
  0xc0   :  { %v136_v55 = vmul.f32 %v135_v54, %v124_v52 }
  0xc2   :  { %v163_v57 = vperm.slane %v136_v55, 0  ;;  %v138_v58 = vmul.f32 %v136_v55, %v110_v33 }
  0xc4   :  { %v139_v59 = vsub.f32 %v137_v56, %v138_v58  ;;  %v165_v60 = vmul.f32 %v163_v57, %v466_v5  ;;  %v166_v0 = vmul.f32 %v163_v57, %v468_v10  ;;  %v160_v10 = vld [vmem:[%s513_s8] sm:$0x1]  ;;  %s285_s8 = sshll.u32 %s398_s7, 4  ;;  %s286_s8 = int_to_ptr.vmem [resolvable:$true] %s285_s8 }
  0xc6   :  { %v168_v61 = vperm.slane %v139_v59, 0 }
  0xc8   :  { %v170_v62 = vadd.f32 %v168_v61, %v165_v60  ;;  %v171_v1 = vadd.f32 %v168_v61, %v166_v0 }
  0xca   :  { %v172_v63 = vmax.f32 %v170_v62, 0.0  ;;  %v173_v2 = vmax.f32 %v171_v1, 0.0 }
  0xcc   :  { %224 = vmatmul.f32.vlgmr.msra.gmra.mxu2 %v172_v63 }
  0xd4   :  { %227 = vmatmul.f32.gmra.mxu2 %v173_v2 }
 0x14f   :  { %v225_v4 = vpop.f32.mrf.mxu2 }
 0x150   :  { %v226_v8 = vadd.f32 %v225_v4, %v202_v3 }
 0x152   :  { %v234_v13 = vadd.f32 %v309_v11, %v226_v8 }
 0x154   :  { %v236_v14 = vmax.f32 %v234_v13, 0.0 }
 0x157   :  { %v228_v7 = vpop.f32.mrf.mxu2 }
 0x158   :  { %v229_v9 = vadd.f32 %v228_v7, %v205_v6 }
 0x15a   :  { %v235_v5 = vadd.f32 %v309_v11, %v229_v9 }
 0x15c   :  { %v237_v12 = vmax.f32 %v235_v5, 0.0 }
 0x15e   :  { %253 = vmatpush.xpose.msra.mxu3 %v237_v12 }
 0x162   :  { %254 = vmatpush.xpose.msra.mxu3 %v236_v14 }
 0x165   :  { %255 = vmatmul.f32.vlgmr.msra.gmra.mxu3 %v160_v10 }
 0x1e8   :  { %v256_v16 = vpop.f32.mrf.mxu3 }
 0x1e9   :  { %v257_v17 = vadd.f32 %v256_v16, %v238_v15 }
 0x1eb   :  { %v303_v18 = vmul.f32 -1.442695, %v257_v17 }
 0x1ed   :  { %312 = vpow2.f32 %v303_v18 }
 0x1f3   :  { %v313_v19 = vpop.eup %312 }
 0x1f4   :  { %v262_v20 = vadd.f32 1.0, %v313_v19 }
 0x1f6   :  { %314 = vrcp.f32 %v262_v20  ;;  %v274_v24 = vand.u32 2147483648, %v262_v20  ;;  %v272_v26 = vand.u32 2147483647, %v262_v20  ;;  %vm268_vm7 = vweird.f32 %v262_v20 }
 0x1f8   :  { %v275_v28 = vor.u32 1.1754944e-38, %v274_v24  ;;  %vm273_vm10 = vcmp.eq.f32.partialorder %v272_v26, 8.507059e+37 }
 0x1fc   :  { %v315_v21 = vpop.eup %314 }
 0x1fd   :  { %v264_v22 = vmul.f32 %v315_v21, %v262_v20  ;;  %vm269_vm6 = vweird.f32 %v315_v21 }
 0x1fe   :  { %vm270_vm8 = vmor %vm268_vm7, %vm269_vm6 }
 0x1ff   :  { %v265_v23 = vsub.f32 1.0, %v264_v22 }
 0x201   :  { %v266_v25 = vmul.f32 %v315_v21, %v265_v23 }
 0x203   :  { %v267_v27 = vadd.f32 %v315_v21, %v266_v25 }
 0x205   :  { %v271_v29 = vsel %vm270_vm8, %v315_v21, %v267_v27 }
 0x206   :  { %v276_v30 = vsel %vm273_vm10, %v275_v28, %v271_v29 }
 0x207   :  { %279 = vst.msk [vmem:[#allocation8] sm:$0x1] %vm278_vm9, %v276_v30 }
 0x208   :  { %290 = dma.vmem_to_hbm [thread:$0]  %s286_s8, 16, %s288_s9, [#allocation5]  }
 0x209   :  { %392 = dma.done.wait [#allocation5], 16  }
 0x20a   :  { %393 = vsyncadd [#allocation5], 4294967280 }
 0x20b   :  { %295 = vsyncpa [#allocation4], 1 }
 0x20c   :  { %296 = vsyncpa [#allocation7], 1 }
 0x20d   :  { %297 = vsyncpa [#allocation5], 1 }

</bundles_post_ra>
